<compile_context>
chip_gen: v5e
topology: v5e:2x2
jax: 0.10.0
libtpu: 0.0.40
codegen_flags: <defaults>
</compile_context>

<pallas_src>
import functools

import jax
import jax.numpy as jnp
from jax import lax
from jax.experimental import pallas as pl
from jax.experimental.pallas import tpu as pltpu

NEG_SLOPE = 0.01  # F.leaky_relu default
# Contract the minor dim of both operands (rhs is "transposed" into the MXU).
_NT_DIMS = (((1,), (1,)), ((), ()))


def _leaky_relu(x):
    # max(x, a*x) == leaky_relu(x) for 0 < a < 1: mul+max instead of cmp+sel+mul.
    return jnp.maximum(x, NEG_SLOPE * x)


def _round_up(x, m):
    return ((x + m - 1) // m) * m


# ----------------------------------------------------------------------------
# Kernel
# ----------------------------------------------------------------------------
def critic_kernel(s_ref, a_ref, w0T_ref, b0_ref, w1hT_ref, w1aT_ref,
                  b1_ref, w2r_ref, b2_ref, o_ref):
    """One batch tile.  Activations are feature-major (features on sublanes,
    batch on the 128-lane axis), so all intermediates and the final
    (1, TILE_B) output block are lane-dense (unmasked stores)."""
    mm = w0T_ref.dtype  # MXU operand dtype (bf16 by default)

    # ---- fc0: x[H0, TB] = leaky_relu(W0^T @ states^T + b0) -----------------
    # states arrive batch-major (TB, S); the transpose is folded into the MXU
    # via NT dimension numbers -- no wrapper-side transpose copy.
    s_mm = s_ref[...].astype(mm)
    x = lax.dot_general(w0T_ref[...], s_mm, _NT_DIMS,
                        preferred_element_type=jnp.float32)
    x = _leaky_relu(x + b0_ref[...])                      # f32 elementwise

    # ---- fc1 on concat([x, a]):  W1h^T @ x + W1a^T @ a^T + b1 --------------
    yh = jnp.dot(w1hT_ref[...], x.astype(mm),
                 preferred_element_type=jnp.float32)
    a_mm = a_ref[...].astype(mm)                           # (TB, A)
    ya = lax.dot_general(w1aT_ref[...], a_mm, _NT_DIMS,    # tiny-K MXU matmul
                         preferred_element_type=jnp.float32)
    y = _leaky_relu(yh + ya + b1_ref[...])

    # ---- fc2 (64 -> 1) on the MXU: M=8 f32 matmul (row 0 = w2) -------------
    q8 = jnp.dot(w2r_ref[...], y, preferred_element_type=jnp.float32)
    o_ref[...] = q8[0:1, :] + b2_ref[0, 0]                 # lane-dense (1, TB)


# ----------------------------------------------------------------------------
# Parameter packing (done once, outside the per-step call)
# ----------------------------------------------------------------------------
def pack_critic_params(params, use_bf16=True):
    """Pre-split / transpose / cast the weights into the kernel's layout."""
    w0, b0, w1, b1, w2, b2 = (params["w0"], params["b0"], params["w1"],
                              params["b1"], params["w2"], params["b2"])
    h0 = w0.shape[1]
    h1 = w1.shape[1]
    mm_dtype = jnp.bfloat16 if use_bf16 else jnp.float32
    w2_row = jnp.zeros((8, h1), jnp.float32).at[0, :].set(
        jnp.asarray(w2, jnp.float32)[:, 0])
    return {
        "w0T":  jnp.asarray(w0.T, mm_dtype),                  # (H0, S)
        "b0c":  jnp.asarray(b0.reshape(-1, 1), jnp.float32),  # (H0, 1)
        "w1hT": jnp.asarray(w1[:h0].T, mm_dtype),              # (H1, H0)
        "w1aT": jnp.asarray(w1[h0:].T, mm_dtype),              # (H1, A)
        "b1c":  jnp.asarray(b1.reshape(-1, 1), jnp.float32),  # (H1, 1)
        "w2r":  w2_row,                                        # (8, H1), row0=w2
        "b2s":  jnp.asarray(b2.reshape(1, 1), jnp.float32),   # (1, 1) -> SMEM
    }


# ----------------------------------------------------------------------------
# Forward wrapper
# ----------------------------------------------------------------------------
def critic_forward(states, actions, packed, *, tile_b_max=8192):
    """states: [B, S], actions: [B, A] -> q-values [B, 1] (float32)."""
    B, S = states.shape
    A = actions.shape[1]

    # --- batch tiling --------------------------------------------------------
    # VMEM budget per tile ~ (inputs 2x-buffered + ~4 live (64,TILE_B) f32
    # activations) ~ 1 KB/row -> 8192-wide tiles use ~10 MB, safe everywhere
    # (v7x 64 MiB physical, v5e 16 MiB default scoped -> raise the limit).
    tile_b = int(min(tile_b_max, _round_up(max(B, 1), 128)))
    nt = -(-B // tile_b)
    if nt > 1 and nt % 2 == 1:
        # Prefer an even tile count so both v7x TensorCores get work.
        nt += 1
        tile_b = int(_round_up(-(-B // nt), 128))
    bp = nt * tile_b

    # Same-dtype batch pad only when needed (no transpose / cast round trip).
    if bp != B:
        states = jnp.pad(states, ((0, bp - B), (0, 0)))
        actions = jnp.pad(actions, ((0, bp - B), (0, 0)))

    def resident(arr):  # weights/biases: same VMEM block every grid step
        return pl.BlockSpec(arr.shape, lambda i: (0, 0))

    out = pl.pallas_call(
        critic_kernel,
        out_shape=jax.ShapeDtypeStruct((1, bp), jnp.float32),
        grid=(nt,),
        in_specs=[
            pl.BlockSpec((tile_b, S), lambda i: (i, 0)),   # states tile (batch-major)
            pl.BlockSpec((tile_b, A), lambda i: (i, 0)),   # actions tile
            resident(packed["w0T"]),
            resident(packed["b0c"]),
            resident(packed["w1hT"]),
            resident(packed["w1aT"]),
            resident(packed["b1c"]),
            resident(packed["w2r"]),
            pl.BlockSpec(memory_space=pltpu.MemorySpace.SMEM),  # b2 scalar
        ],
        out_specs=pl.BlockSpec((1, tile_b), lambda i: (0, i)),  # lane-dense
        compiler_params=pltpu.CompilerParams(
            dimension_semantics=("parallel",),
            vmem_limit_bytes=48 * 1024 * 1024),
    )(states, actions, packed["w0T"], packed["b0c"], packed["w1hT"],
      packed["w1aT"], packed["b1c"], packed["w2r"], packed["b2s"])

    return out.reshape(bp, 1)[:B]


# ----------------------------------------------------------------------------
# Init (mirrors Critic.__init__ / reset_parameters) and pure-JAX reference
# ----------------------------------------------------------------------------
def init_critic_params(key, state_size, action_size, fc_layers=(64, 64)):
    """hidden_init uses fan_in = weight.size()[0] == out_features (mirrors the
    reference code's quirk); last layer uniform(-3e-3, 3e-3); biases use the
    default nn.Linear init uniform(-1/sqrt(in_features), 1/sqrt(in_features))."""
    layer_sizes = [state_size] + list(fc_layers) + [1]
    dims = []
    for i, (fin, fout) in enumerate(zip(layer_sizes, layer_sizes[1:])):
        if i == 1:
            fin += action_size
        dims.append((fin, fout))

    params = {}
    keys = jax.random.split(key, 2 * len(dims))
    for i, (fin, fout) in enumerate(dims):
        wk, bk = keys[2 * i], keys[2 * i + 1]
        if i == len(dims) - 1:
            wlim = 3e-3
        else:
            wlim = 1.0 / jnp.sqrt(jnp.float32(fout))
        blim = 1.0 / jnp.sqrt(jnp.float32(fin))
        params[f"w{i}"] = jax.random.uniform(
            wk, (fin, fout), jnp.float32, minval=-wlim, maxval=wlim)
        params[f"b{i}"] = jax.random.uniform(
            bk, (1, fout), jnp.float32, minval=-blim, maxval=blim)
    return params


def critic_reference(states, actions, params, matmul_dtype=jnp.float32):
    """Pure-JAX reference of the PyTorch forward.  `matmul_dtype=bfloat16`
    mimics the kernel's reduced-precision MXU operands for tight checking."""
    hi = lax.Precision.HIGHEST
    md = matmul_dtype
    h0 = params["w0"].shape[1]
    x = jnp.dot(states.astype(md), params["w0"].astype(md),
                preferred_element_type=jnp.float32, precision=hi) + params["b0"]
    x = _leaky_relu(x)
    y = (jnp.dot(x.astype(md), params["w1"][:h0].astype(md),
                 preferred_element_type=jnp.float32, precision=hi)
         + jnp.dot(actions.astype(md), params["w1"][h0:].astype(md),
                   preferred_element_type=jnp.float32, precision=hi)
         + params["b1"])
    y = _leaky_relu(y)
    return jnp.dot(y, params["w2"], preferred_element_type=jnp.float32,
                   precision=hi) + params["b2"]


if __name__ == "__main__":
    STATE, ACTION = 16, 4
    key = jax.random.PRNGKey(0)
    k_params, k_data = jax.random.split(key)

    params = init_critic_params(k_params, STATE, ACTION, fc_layers=(64, 64))
    packed = pack_critic_params(params, use_bf16=True)

    forward = jax.jit(critic_forward)
    forward_multi_tile = jax.jit(functools.partial(critic_forward, tile_b_max=128))

    # (batch, forward fn): small single-tile case, plus a small multi-tile /
    # ragged-batch case to exercise the grid + padding path.
    cases = [(8, forward), (300, forward_multi_tile)]
    for B, fwd in cases:
        k_s, k_a = jax.random.split(jax.random.fold_in(k_data, B))
        states = jax.random.normal(k_s, (B, STATE), jnp.float32)
        actions = jax.random.normal(k_a, (B, ACTION), jnp.float32)

        out = jax.block_until_ready(fwd(states, actions, packed))
        assert out.shape == (B, 1)

        # Tight check vs a reference mirroring the kernel's bf16 MXU operands
        # (f32 accumulation), loose sanity check vs full-f32 math.
        ref_bf16 = critic_reference(states, actions, params, jnp.bfloat16)
        ref_f32 = critic_reference(states, actions, params, jnp.float32)
        assert jnp.allclose(out, ref_bf16, atol=1e-4, rtol=1e-2), \
            f"mismatch vs bf16 reference (B={B})"
        assert jnp.allclose(out, ref_f32, atol=2e-3, rtol=5e-2), \
            f"mismatch vs f32 reference (B={B})"

    print("KERNEL_OK")
</pallas_src>

<mosaic_0001>
module attributes {stable_mosaic.version = 11 : i64} {
  func.func @critic_kernel(%arg0: i32, %arg1: memref<128x16xf32, #tpu.memory_space<vmem>>, %arg2: memref<128x4xf32, #tpu.memory_space<vmem>>, %arg3: memref<64x16xbf16, #tpu.memory_space<vmem>>, %arg4: memref<64x1xf32, #tpu.memory_space<vmem>>, %arg5: memref<64x64xbf16, #tpu.memory_space<vmem>>, %arg6: memref<64x4xbf16, #tpu.memory_space<vmem>>, %arg7: memref<64x1xf32, #tpu.memory_space<vmem>>, %arg8: memref<8x64xf32, #tpu.memory_space<vmem>>, %arg9: memref<1x1xf32, #tpu.memory_space<smem>>, %arg10: memref<1x128xf32, #tpu.memory_space<vmem>>) attributes {dimension_semantics = [#tpu.dimension_semantics<parallel>], iteration_bounds = array<i64: 1>, scalar_prefetch = 0 : i64, scratch_operands = 0 : i64, tpu.core_type = #tpu.core_type<tc>, window_params = [{transform_indices = @transform_0, window_bounds = array<i64: 128, 16>}, {transform_indices = @transform_1, window_bounds = array<i64: 128, 4>}, {pipeline_mode = #tpu.pipeline_mode<synchronous>, transform_indices = @transform_2, window_bounds = array<i64: 64, 16>}, {pipeline_mode = #tpu.pipeline_mode<synchronous>, transform_indices = @transform_3, window_bounds = array<i64: 64, 1>}, {pipeline_mode = #tpu.pipeline_mode<synchronous>, transform_indices = @transform_4, window_bounds = array<i64: 64, 64>}, {pipeline_mode = #tpu.pipeline_mode<synchronous>, transform_indices = @transform_5, window_bounds = array<i64: 64, 4>}, {pipeline_mode = #tpu.pipeline_mode<synchronous>, transform_indices = @transform_6, window_bounds = array<i64: 64, 1>}, {pipeline_mode = #tpu.pipeline_mode<synchronous>, transform_indices = @transform_7, window_bounds = array<i64: 8, 64>}, {transform_indices = @transform_8, window_bounds = array<i64: 1, 1>}, {transform_indices = @transform_9, window_bounds = array<i64: 1, 128>}]} {
    %c0 = arith.constant 0 : index
    %c0_0 = arith.constant 0 : index
    %0 = vector.load %arg1[%c0, %c0_0] : memref<128x16xf32, #tpu.memory_space<vmem>>, vector<128x16xf32>
    %1 = arith.truncf %0 : vector<128x16xf32> to vector<128x16xbf16>
    %c0_1 = arith.constant 0 : index
    %c0_2 = arith.constant 0 : index
    %2 = vector.load %arg3[%c0_1, %c0_2] : memref<64x16xbf16, #tpu.memory_space<vmem>>, vector<64x16xbf16>
    %cst = arith.constant dense<0.000000e+00> : vector<64x128xf32>
    %3 = tpu.matmul %2, %1, %cst {dimension_numbers = #tpu.dot_dimension_numbers<[1], [1], [0], [0], [0, 0, 1, 0], [], []>} : vector<64x16xbf16>, vector<128x16xbf16>, vector<64x128xf32> -> vector<64x128xf32>
    %c0_3 = arith.constant 0 : index
    %c0_4 = arith.constant 0 : index
    %4 = vector.load %arg4[%c0_3, %c0_4] : memref<64x1xf32, #tpu.memory_space<vmem>>, vector<64x1xf32>
    %5 = vector.broadcast %4 : vector<64x1xf32> to vector<64x128xf32>
    %6 = arith.addf %3, %5 : vector<64x128xf32>
    %cst_5 = arith.constant 0.00999999977 : f32
    %7 = vector.broadcast %cst_5 : f32 to vector<64x128xf32>
    %8 = arith.mulf %7, %6 : vector<64x128xf32>
    %9 = arith.maximumf %6, %8 : vector<64x128xf32>
    %c0_6 = arith.constant 0 : index
    %c0_7 = arith.constant 0 : index
    %10 = vector.load %arg5[%c0_6, %c0_7] : memref<64x64xbf16, #tpu.memory_space<vmem>>, vector<64x64xbf16>
    %11 = arith.truncf %9 : vector<64x128xf32> to vector<64x128xbf16>
    %cst_8 = arith.constant dense<0.000000e+00> : vector<64x128xf32>
    %12 = tpu.matmul %10, %11, %cst_8 {dimension_numbers = #tpu.dot_dimension_numbers<[1], [0], [0], [1], [0, 0, 1, 1], [], []>} : vector<64x64xbf16>, vector<64x128xbf16>, vector<64x128xf32> -> vector<64x128xf32>
    %c0_9 = arith.constant 0 : index
    %c0_10 = arith.constant 0 : index
    %13 = vector.load %arg2[%c0_9, %c0_10] : memref<128x4xf32, #tpu.memory_space<vmem>>, vector<128x4xf32>
    %14 = arith.truncf %13 : vector<128x4xf32> to vector<128x4xbf16>
    %c0_11 = arith.constant 0 : index
    %c0_12 = arith.constant 0 : index
    %15 = vector.load %arg6[%c0_11, %c0_12] : memref<64x4xbf16, #tpu.memory_space<vmem>>, vector<64x4xbf16>
    %cst_13 = arith.constant dense<0.000000e+00> : vector<64x128xf32>
    %16 = tpu.matmul %15, %14, %cst_13 {dimension_numbers = #tpu.dot_dimension_numbers<[1], [1], [0], [0], [0, 0, 1, 0], [], []>} : vector<64x4xbf16>, vector<128x4xbf16>, vector<64x128xf32> -> vector<64x128xf32>
    %17 = arith.addf %12, %16 : vector<64x128xf32>
    %c0_14 = arith.constant 0 : index
    %c0_15 = arith.constant 0 : index
    %18 = vector.load %arg7[%c0_14, %c0_15] : memref<64x1xf32, #tpu.memory_space<vmem>>, vector<64x1xf32>
    %19 = vector.broadcast %18 : vector<64x1xf32> to vector<64x128xf32>
    %20 = arith.addf %17, %19 : vector<64x128xf32>
    %cst_16 = arith.constant 0.00999999977 : f32
    %21 = vector.broadcast %cst_16 : f32 to vector<64x128xf32>
    %22 = arith.mulf %21, %20 : vector<64x128xf32>
    %23 = arith.maximumf %20, %22 : vector<64x128xf32>
    %c0_17 = arith.constant 0 : index
    %c0_18 = arith.constant 0 : index
    %24 = vector.load %arg8[%c0_17, %c0_18] : memref<8x64xf32, #tpu.memory_space<vmem>>, vector<8x64xf32>
    %cst_19 = arith.constant dense<0.000000e+00> : vector<8x128xf32>
    %25 = tpu.matmul %24, %23, %cst_19 {dimension_numbers = #tpu.dot_dimension_numbers<[1], [0], [0], [1], [0, 0, 1, 1], [], []>} : vector<8x64xf32>, vector<64x128xf32>, vector<8x128xf32> -> vector<8x128xf32>
    %26 = vector.extract_strided_slice %25 {offsets = [0, 0], sizes = [1, 128], strides = [1, 1]} : vector<8x128xf32> to vector<1x128xf32>
    %c0_20 = arith.constant 0 : index
    %c0_21 = arith.constant 0 : index
    %27 = memref.load %arg9[%c0_20, %c0_21] : memref<1x1xf32, #tpu.memory_space<smem>>
    %28 = vector.broadcast %27 : f32 to vector<1x128xf32>
    %29 = arith.addf %26, %28 : vector<1x128xf32>
    %c0_22 = arith.constant 0 : index
    %c0_23 = arith.constant 0 : index
    %30 = vector.load %arg10[%c0_22, %c0_23] : memref<1x128xf32, #tpu.memory_space<vmem>>, vector<1x128xf32>
    tpu.vector_store %arg10[%c0_22, %c0_23], %29 {strides = array<i32>} : memref<1x128xf32, #tpu.memory_space<vmem>>, vector<1x128xf32>,
    return
  }
  func.func @transform_0(%arg0: i32) -> (i32, i32) {
    %c0_i32 = arith.constant 0 : i32
    %c0_i32_0 = arith.constant 0 : i32
    return %arg0, %c0_i32 : i32, i32
  }
  func.func @transform_1(%arg0: i32) -> (i32, i32) {
    %c0_i32 = arith.constant 0 : i32
    %c0_i32_0 = arith.constant 0 : i32
    return %arg0, %c0_i32 : i32, i32
  }
  func.func @transform_2(%arg0: i32) -> (i32, i32) {
    %c0_i32 = arith.constant 0 : i32
    %c0_i32_0 = arith.constant 0 : i32
    %c0_i32_1 = arith.constant 0 : i32
    return %c0_i32, %c0_i32_0 : i32, i32
  }
  func.func @transform_3(%arg0: i32) -> (i32, i32) {
    %c0_i32 = arith.constant 0 : i32
    %c0_i32_0 = arith.constant 0 : i32
    %c0_i32_1 = arith.constant 0 : i32
    return %c0_i32, %c0_i32_0 : i32, i32
  }
  func.func @transform_4(%arg0: i32) -> (i32, i32) {
    %c0_i32 = arith.constant 0 : i32
    %c0_i32_0 = arith.constant 0 : i32
    %c0_i32_1 = arith.constant 0 : i32
    return %c0_i32, %c0_i32_0 : i32, i32
  }
  func.func @transform_5(%arg0: i32) -> (i32, i32) {
    %c0_i32 = arith.constant 0 : i32
    %c0_i32_0 = arith.constant 0 : i32
    %c0_i32_1 = arith.constant 0 : i32
    return %c0_i32, %c0_i32_0 : i32, i32
  }
  func.func @transform_6(%arg0: i32) -> (i32, i32) {
    %c0_i32 = arith.constant 0 : i32
    %c0_i32_0 = arith.constant 0 : i32
    %c0_i32_1 = arith.constant 0 : i32
    return %c0_i32, %c0_i32_0 : i32, i32
  }
  func.func @transform_7(%arg0: i32) -> (i32, i32) {
    %c0_i32 = arith.constant 0 : i32
    %c0_i32_0 = arith.constant 0 : i32
    %c0_i32_1 = arith.constant 0 : i32
    return %c0_i32, %c0_i32_0 : i32, i32
  }
  func.func @transform_8(%arg0: i32) -> (i32, i32) {
    %c0_i32 = arith.constant 0 : i32
    %c0_i32_0 = arith.constant 0 : i32
    %c0_i32_1 = arith.constant 0 : i32
    return %c0_i32, %c0_i32_0 : i32, i32
  }
  func.func @transform_9(%arg0: i32) -> (i32, i32) {
    %c0_i32 = arith.constant 0 : i32
    %c0_i32_0 = arith.constant 0 : i32
    return %c0_i32, %arg0 : i32, i32
  }
}

</mosaic_0001>

<bundles_post_ra>
// kernel: critic_forward.1
= control target key start
LH: loop header
LB: loop body
LE: loop exit
PB: predicated region body
PF: predicated region fallthrough
CT: control target
= control target key end

     0   :  { %vm134_vm0 = vcmask 130048   ;;  %v597_v20 = vmov 0   ;;  %vm280_vm1 = vcmask 31744   ;;  %vm366_vm2 = vcmask 523264   ;;  %s866_s0 = inlined_call_operand.vmem [shape: f32[128,16], index: 0, kind: input, shape index: {}]   ;;  %s867_s3 = inlined_call_operand.vmem [shape: f32[64,1], index: 3, kind: input, shape index: {}]   ;;  %s868_s6 = inlined_call_operand.vmem [shape: f32[64,1], index: 6, kind: input, shape index: {}]   ;;  %s869_s2 = inlined_call_operand.vmem [shape: bf16[64,16], index: 2, kind: input, shape index: {}]   ;;  %s870_s1 = inlined_call_operand.vmem [shape: f32[128,4], index: 1, kind: input, shape index: {}]   ;;  %s871_s5 = inlined_call_operand.vmem [shape: bf16[64,4], index: 5, kind: input, shape index: {}]   ;;  %s872_s4 = inlined_call_operand.vmem [shape: bf16[64,64], index: 4, kind: input, shape index: {}]   ;;  %s873_s7 = inlined_call_operand.vmem [shape: f32[8,64], index: 7, kind: input, shape index: {}]   ;;  %s874_s8 = inlined_call_operand.<no memory space> [shape: f32[1,1], index: 8, kind: input, shape index: {}]   ;;  %s875_s9 = inlined_call_operand.vmem [shape: f32[1,128], index: 9, kind: output, shape index: {}]  }
   0x1   :  { %v48_v0 = vld [vmem:[%s866_s0 + $0x70] sm:$0xff]  ;;  %v49_v1 = vld [vmem:[%s866_s0 + $0x78] sm:$0xff]  ;;  %v46_v3 = vld [vmem:[%s866_s0 + $0x60] sm:$0xff]  ;;  %594 = vset.pattern.permute.xlu0 %v597_v20  ;;  %595 = vset.pattern.permute.xlu1 %v597_v20 }
   0x2   :  { %v57_v2 = vpack.c.bf16 %v49_v1, %v48_v0  ;;  %v47_v4 = vld [vmem:[%s866_s0 + $0x68] sm:$0xff]  ;;  %v44_v8 = vld [vmem:[%s866_s0 + $0x50] sm:$0xff]  ;;  %v45_v9 = vld [vmem:[%s866_s0 + $0x58] sm:$0xff]  ;;  %596 = vset.pattern.permute.xlu2 %v597_v20 }
   0x3   :  { %v56_v6 = vpack.c.bf16 %v47_v4, %v46_v3  ;;  %v55_v10 = vpack.c.bf16 %v45_v9, %v44_v8  ;;  %v42_v12 = vld [vmem:[%s866_s0 + $0x40] sm:$0xff]  ;;  %v43_v13 = vld [vmem:[%s866_s0 + $0x48] sm:$0xff]  ;;  %v40_v16 = vld [vmem:[%s866_s0 + $0x30] sm:$0xff] }
   0x4   :  { %v169_v5 = vsel %vm134_vm0, %v57_v2, 0  ;;  %v54_v14 = vpack.c.bf16 %v43_v13, %v42_v12  ;;  %v41_v17 = vld [vmem:[%s866_s0 + $0x38] sm:$0xff]  ;;  %v72_v18 = vld [vmem:[%s867_s3 + $0x30] sm:$0xff]  ;;  %v38_v22 = vld [vmem:[%s866_s0 + $0x20] sm:$0xff] }
   0x5   :  { %171 = vmatpush.bf16.xpose.msra.mxu0 %v169_v5  ;;  %585 = vmatpush.bf16.xpose.msra.mxu3 %v169_v5  ;;  %v166_v7 = vsel %vm134_vm0, %v56_v6, 0  ;;  %v163_v11 = vsel %vm134_vm0, %v55_v10, 0  ;;  %v53_v19 = vpack.c.bf16 %v41_v17, %v40_v16  ;;  %v39_v23 = vld [vmem:[%s866_s0 + $0x28] sm:$0xff]  ;;  %v73_v24 = vld [vmem:[%s867_s3 + $0x38] sm:$0xff]  ;;  %v70_v25 = vld [vmem:[%s867_s3 + $0x20] sm:$0xff] }
   0x6   :  { %v160_v15 = vsel %vm134_vm0, %v54_v14, 0  ;;  %106 = vperm.xlu0 %594, %v72_v18   ;;  %v52_v26 = vpack.c.bf16 %v39_v23, %v38_v22  ;;  %96 = vperm.xlu1 %595, %v70_v25   ;;  %v36_v28 = vld [vmem:[%s866_s0 + $0x10] sm:$0xff]  ;;  %v37_v29 = vld [vmem:[%s866_s0 + $0x18] sm:$0xff]  ;;  %v71_v30 = vld [vmem:[%s867_s3 + $0x28] sm:$0xff] }
   0x7   :  { %v157_v21 = vsel %vm134_vm0, %v53_v19, 0  ;;  %v66_v31 = vld [vmem:[%s867_s3] sm:$0xff]  ;;  %v51_v32 = vpack.c.bf16 %v37_v29, %v36_v28  ;;  %v35_v35 = vld [vmem:[%s866_s0 + $0x8] sm:$0xff]  ;;  %v414_v37 = vld [vmem:[%s868_s6 + $0x30] sm:$0xff] }
   0x8   :  { %v154_v27 = vsel %vm134_vm0, %v52_v26, 0  ;;  %v34_v34 = vld [vmem:[%s866_s0] sm:$0xff]  ;;  %v67_v36 = vld [vmem:[%s867_s3 + $0x8] sm:$0xff]  ;;  %v411_v40 = vld [vmem:[%s868_s6 + $0x18] sm:$0xff] }
   0x9   :  { %v151_v33 = vsel %vm134_vm0, %v51_v32, 0  ;;  %v50_v38 = vpack.c.bf16 %v35_v35, %v34_v34  ;;  %v573_v41 = vld [vmem:[%s869_s2] sm:$0xff]  ;;  %v576_v42 = vld [vmem:[%s869_s2 + $0x18] sm:$0xff]  ;;  %v413_v43 = vld [vmem:[%s868_s6 + $0x28] sm:$0xff] }
   0xa   :  { %v68_v44 = vld [vmem:[%s867_s3 + $0x10] sm:$0xff]  ;;  %v408_v45 = vld [vmem:[%s868_s6] sm:$0xff]  ;;  %v69_v47 = vld [vmem:[%s867_s3 + $0x18] sm:$0xff] }
   0xb   :  { %v148_v39 = vsel %vm134_vm0, %v50_v38, 0  ;;  %86 = vperm.xlu2 %596, %v68_v44   ;;  %v410_v46 = vld [vmem:[%s868_s6 + $0x10] sm:$0xff]  ;;  %v574_v48 = vld [vmem:[%s869_s2 + $0x8] sm:$0xff]  ;;  %v415_v49 = vld [vmem:[%s868_s6 + $0x38] sm:$0xff] }
   0xc   :  { %v412_v50 = vld [vmem:[%s868_s6 + $0x20] sm:$0xff]  ;;  %v575_v51 = vld [vmem:[%s869_s2 + $0x10] sm:$0xff]  ;;  %v409_v52 = vld [vmem:[%s868_s6 + $0x8] sm:$0xff] }
   0xd   :  { %172 = vmatpush.bf16.xpose.msra.mxu0 %v166_v7  ;;  %586 = vmatpush.bf16.xpose.msra.mxu3 %v166_v7  ;;  %v242_v53 = vld [vmem:[%s870_s1 + $0x70] sm:$0xff]  ;;  %v243_v54 = vld [vmem:[%s870_s1 + $0x78] sm:$0xff]  ;;  %v240_v57 = vld [vmem:[%s870_s1 + $0x60] sm:$0xff] }
   0xe   :  { %111 = vperm.xlu0 %594, %v73_v24   ;;  %101 = vperm.xlu1 %595, %v71_v30   ;;  %v251_v55 = vpack.c.bf16 %v243_v54, %v242_v53  ;;  %v241_v58 = vld [vmem:[%s870_s1 + $0x68] sm:$0xff]  ;;  %v238_v61 = vld [vmem:[%s870_s1 + $0x50] sm:$0xff]  ;;  %v239_v62 = vld [vmem:[%s870_s1 + $0x58] sm:$0xff] }
   0xf   :  { %v250_v59 = vpack.c.bf16 %v241_v58, %v240_v57  ;;  %v249_v63 = vpack.c.bf16 %v239_v62, %v238_v61  ;;  %v236_v1 = vld [vmem:[%s870_s1 + $0x40] sm:$0xff]  ;;  %v237_v2 = vld [vmem:[%s870_s1 + $0x48] sm:$0xff]  ;;  %v234_v5 = vld [vmem:[%s870_s1 + $0x30] sm:$0xff] }
  0x10   :  { %v315_v56 = vsel %vm280_vm1, %v251_v55, 0  ;;  %v248_v3 = vpack.c.bf16 %v237_v2, %v236_v1  ;;  %v235_v6 = vld [vmem:[%s870_s1 + $0x38] sm:$0xff]  ;;  %v232_v9 = vld [vmem:[%s870_s1 + $0x20] sm:$0xff]  ;;  %v233_v10 = vld [vmem:[%s870_s1 + $0x28] sm:$0xff] }
  0x11   :  { %317 = vmatpush.bf16.xpose.msra.mxu1 %v315_v56  ;;  %v312_v60 = vsel %vm280_vm1, %v250_v59, 0  ;;  %v309_v0 = vsel %vm280_vm1, %v249_v63, 0  ;;  %v247_v7 = vpack.c.bf16 %v235_v6, %v234_v5  ;;  %v246_v12 = vpack.c.bf16 %v233_v10, %v232_v9  ;;  %v230_v16 = vld [vmem:[%s870_s1 + $0x10] sm:$0xff]  ;;  %v231_v17 = vld [vmem:[%s870_s1 + $0x18] sm:$0xff]  ;;  %v228_v26 = vld [vmem:[%s870_s1] sm:$0xff] }
  0x12   :  { %v306_v4 = vsel %vm280_vm1, %v248_v3, 0  ;;  %v245_v19 = vpack.c.bf16 %v231_v17, %v230_v16  ;;  %v583_v2 = vld [vmem:[%s871_s5 + $0x10] sm:$0xff]  ;;  %v584_v5 = vld [vmem:[%s871_s5 + $0x18] sm:$0xff]  ;;  %v578_v6 = vld [vmem:[%s872_s4 + $0x8] sm:$0xff] }
  0x13   :  { %91 = vperm.xlu2 %596, %v69_v47   ;;  %v303_v8 = vsel %vm280_vm1, %v247_v7, 0  ;;  %v300_v13 = vsel %vm280_vm1, %v246_v12, 0  ;;  %v579_v7 = vld [vmem:[%s872_s4 + $0x10] sm:$0xff] }
  0x15   :  { %173 = vmatpush.bf16.xpose.msra.mxu0 %v163_v11  ;;  %587 = vmatpush.bf16.xpose.msra.mxu3 %v163_v11 }
  0x16   :  { %76 = vperm.xlu0 %594, %v66_v31   ;;  %81 = vperm.xlu1 %595, %v67_v36  }
  0x19   :  { %318 = vmatpush.bf16.xpose.msra.mxu1 %v312_v60 }
  0x1b   :  { %453 = vperm.xlu2 %596, %v415_v49  }
  0x1d   :  { %174 = vmatpush.bf16.xpose.msra.mxu0 %v160_v15  ;;  %588 = vmatpush.bf16.xpose.msra.mxu3 %v160_v15 }
  0x1e   :  { %448 = vperm.xlu0 %594, %v414_v37   ;;  %443 = vperm.xlu1 %595, %v413_v43   ;;  %v581_v37 = vld [vmem:[%s871_s5] sm:$0xff]  ;;  %v582_v43 = vld [vmem:[%s871_s5 + $0x8] sm:$0xff] }
  0x21   :  { %319 = vmatpush.bf16.xpose.msra.mxu1 %v309_v0 }
  0x23   :  { %438 = vperm.xlu2 %596, %v412_v50  }
  0x25   :  { %175 = vmatpush.bf16.xpose.msra.mxu0 %v157_v21  ;;  %589 = vmatpush.bf16.xpose.msra.mxu3 %v157_v21  ;;  %v297_v21 = vsel %vm280_vm1, %v245_v19, 0 }
  0x26   :  { %433 = vperm.xlu0 %594, %v411_v40   ;;  %428 = vperm.xlu1 %595, %v410_v46  }
  0x29   :  { %320 = vmatpush.bf16.xpose.msra.mxu1 %v306_v4  ;;  %v577_v4 = vld [vmem:[%s872_s4] sm:$0xff] }
  0x2b   :  { %423 = vperm.xlu2 %596, %v409_v52  }
  0x2d   :  { %176 = vmatpush.bf16.xpose.msra.mxu0 %v154_v27  ;;  %590 = vmatpush.bf16.xpose.msra.mxu3 %v154_v27  ;;  %v229_v27 = vld [vmem:[%s870_s1 + $0x8] sm:$0xff] }
  0x2e   :  { %418 = vperm.xlu0 %594, %v408_v45   ;;  %v244_v29 = vpack.c.bf16 %v229_v27, %v228_v26 }
  0x30   :  { %v294_v32 = vsel %vm280_vm1, %v244_v29, 0 }
  0x31   :  { %321 = vmatpush.bf16.xpose.msra.mxu1 %v303_v8  ;;  %v580_v8 = vld [vmem:[%s872_s4 + $0x18] sm:$0xff] }
  0x35   :  { %177 = vmatpush.bf16.xpose.msra.mxu0 %v151_v33  ;;  %591 = vmatpush.bf16.xpose.msra.mxu3 %v151_v33 }
  0x39   :  { %322 = vmatpush.bf16.xpose.msra.mxu1 %v300_v13 }
  0x3d   :  { %178 = vmatpush.bf16.xpose.msra.mxu0 %v148_v39  ;;  %592 = vmatpush.bf16.xpose.msra.mxu3 %v148_v39 }
  0x41   :  { %323 = vmatpush.bf16.xpose.msra.mxu1 %v297_v21 }
  0x44   :  { %528 = vmatmul.msk.bf16.vlgmr.msra.gmra.mxu0 %vm134_vm0, %v573_v41  ;;  %531 = vmatmul.msk.bf16.vlgmr.msra.gmra.mxu3 %vm134_vm0, %v576_v42 }
  0x49   :  { %324 = vmatpush.bf16.xpose.msra.mxu1 %v294_v32 }
  0x50   :  { %548 = vmatmul.msk.bf16.vlgmr.msra.gmra.mxu1 %vm280_vm1, %v581_v37 }
  0x54   :  { %529 = vmatmul.msk.bf16.gmra.mxu0 %vm134_vm0, %v574_v48 }
  0x60   :  { %549 = vmatmul.msk.bf16.gmra.mxu1 %vm280_vm1, %v582_v43 }
  0x64   :  { %530 = vmatmul.msk.bf16.gmra.mxu0 %vm134_vm0, %v575_v51 }
  0x65   :  { %v87_v38 = vpop.permute.xlu2 %86 }
  0x6d   :  { %v92_v42 = vpop.permute.xlu2 %91 }
  0x70   :  { %550 = vmatmul.msk.bf16.gmra.mxu1 %vm280_vm1, %v583_v2  ;;  %v505_v2 = vstv %s874_s8 }
  0x78   :  { %v107_v14 = vpop.permute.xlu0 %106  ;;  %v97_v34 = vpop.permute.xlu1 %96 }
  0x80   :  { %v112_v23 = vpop.permute.xlu0 %111  ;;  %v102_v39 = vpop.permute.xlu1 %101  ;;  %551 = vmatmul.msk.bf16.gmra.mxu1 %vm280_vm1, %v584_v5 }
  0x88   :  { %v82_v45 = vpop.permute.xlu1 %81  ;;  %v77_v50 = vpop.permute.xlu0 %76 }
  0x90   :  { %v444_v27 = vpop.permute.xlu1 %443 }
  0xc1   :  { %v180_v11 = vpop.f32.mrf.mxu0 }
  0xc2   :  { %v181_v54 = vadd.f32 %v180_v11, %v77_v50 }
  0xc4   :  { %v200_v61 = vmul.f32 0.01, %v181_v54 }
  0xc6   :  { %v208_v1 = vmax.f32 %v181_v54, %v200_v61 }
  0xc7   :  { %v195_v15 = vpop.f32.mrf.mxu3 }
  0xc8   :  { %v196_v20 = vadd.f32 %v195_v15, %v107_v14 }
  0xc9   :  { %v182_v18 = vpop.f32.mrf.mxu0 }
  0xca   :  { %v206_v22 = vmul.f32 0.01, %v196_v20  ;;  %v183_v51 = vadd.f32 %v182_v18, %v82_v45 }
  0xcc   :  { %v214_v31 = vmax.f32 %v196_v20, %v206_v22  ;;  %v201_v58 = vmul.f32 0.01, %v183_v51  ;;  %v454_v22 = vpop.permute.xlu2 %453 }
  0xcd   :  { %v326_v9 = vpop.f32.mrf.mxu1 }
  0xce   :  { %v209_v63 = vmax.f32 %v183_v51, %v201_v58 }
  0xcf   :  { %v197_v24 = vpop.f32.mrf.mxu3 }
  0xd0   :  { %v198_v25 = vadd.f32 %v197_v24, %v112_v23  ;;  %v224_v3 = vpack.c.bf16 %v209_v63, %v208_v1  ;;  %v449_v24 = vpop.permute.xlu0 %448  ;;  %v480_v1 = vld [vmem:[%s873_s7] sm:$0xff] }
  0xd1   :  { %v185_v28 = vpop.f32.mrf.mxu0 }
  0xd2   :  { %v207_v30 = vmul.f32 0.01, %v198_v25  ;;  %v186_v47 = vadd.f32 %v185_v28, %v87_v38 }
  0xd4   :  { %v215_v33 = vmax.f32 %v198_v25, %v207_v30  ;;  %v202_v55 = vmul.f32 0.01, %v186_v47  ;;  %v439_v28 = vpop.permute.xlu2 %438 }
  0xd5   :  { %v328_v10 = vpop.f32.mrf.mxu1 }
  0xd6   :  { %v227_v35 = vpack.c.bf16 %v215_v33, %v214_v31  ;;  %v210_v62 = vmax.f32 %v186_v47, %v202_v55  ;;  %v429_v47 = vpop.permute.xlu1 %428 }
  0xd8   :  { %383 = vmatpush.bf16.msra.mxu2 %v227_v35  ;;  %v434_v35 = vpop.permute.xlu0 %433 }
  0xd9   :  { %v187_v36 = vpop.f32.mrf.mxu0 }
  0xda   :  { %v188_v44 = vadd.f32 %v187_v36, %v92_v42 }
  0xdc   :  { %v203_v52 = vmul.f32 0.01, %v188_v44  ;;  %v424_v51 = vpop.permute.xlu2 %423 }
  0xdd   :  { %v331_v13 = vpop.f32.mrf.mxu1 }
  0xde   :  { %v211_v59 = vmax.f32 %v188_v44, %v203_v52 }
  0xe0   :  { %v225_v0 = vpack.c.bf16 %v211_v59, %v210_v62  ;;  %v419_v55 = vpop.permute.xlu0 %418 }
  0xe1   :  { %v190_v40 = vpop.f32.mrf.mxu0 }
  0xe2   :  { %v191_v41 = vadd.f32 %v190_v40, %v97_v34 }
  0xe4   :  { %v204_v48 = vmul.f32 0.01, %v191_v41 }
  0xe5   :  { %v333_v15 = vpop.f32.mrf.mxu1 }
  0xe6   :  { %v212_v56 = vmax.f32 %v191_v41, %v204_v48 }
  0xe9   :  { %v192_v46 = vpop.f32.mrf.mxu0 }
  0xea   :  { %v193_v49 = vadd.f32 %v192_v46, %v102_v39 }
  0xec   :  { %v205_v53 = vmul.f32 0.01, %v193_v49 }
  0xed   :  { %v336_v18 = vpop.f32.mrf.mxu1 }
  0xee   :  { %v213_v57 = vmax.f32 %v193_v49, %v205_v53 }
  0xf0   :  { %v226_v60 = vpack.c.bf16 %v213_v57, %v212_v56 }
  0xf2   :  { %384 = vmatpush.bf16.msra.mxu2 %v226_v60 }
  0xf5   :  { %v338_v20 = vpop.f32.mrf.mxu1 }
  0xf6   :  { %385 = vmatpush.bf16.msra.mxu2 %v225_v0 }
  0xfa   :  { %386 = vmatpush.bf16.msra.mxu2 %v224_v3 }
  0xfd   :  { %568 = vmatmul.msk.bf16.vlgmr.msra.gmra.mxu2 %vm366_vm2, %v577_v4  ;;  %v341_v23 = vpop.f32.mrf.mxu1 }
 0x105   :  { %v343_v30 = vpop.f32.mrf.mxu1 }
 0x10d   :  { %569 = vmatmul.msk.bf16.gmra.mxu2 %vm366_vm2, %v578_v6 }
 0x11d   :  { %570 = vmatmul.msk.bf16.gmra.mxu2 %vm366_vm2, %v579_v7 }
 0x12d   :  { %571 = vmatmul.msk.bf16.gmra.mxu2 %vm366_vm2, %v580_v8 }
 0x180   :  { %v388_v11 = vpop.f32.mrf.mxu2 }
 0x181   :  { %v389_v12 = vadd.f32 %v388_v11, %v326_v9 }
 0x183   :  { %v456_v56 = vadd.f32 %v419_v55, %v389_v12 }
 0x185   :  { %v464_v62 = vmul.f32 0.01, %v456_v56 }
 0x187   :  { %v472_v0 = vmax.f32 %v456_v56, %v464_v62 }
 0x188   :  { %v390_v14 = vpop.f32.mrf.mxu2 }
 0x189   :  { %v391_v43 = vadd.f32 %v390_v14, %v328_v10 }
 0x18b   :  { %v457_v52 = vadd.f32 %v424_v51, %v391_v43 }
 0x18d   :  { %v465_v60 = vmul.f32 0.01, %v457_v52 }
 0x18f   :  { %v473_v63 = vmax.f32 %v457_v52, %v465_v60 }
 0x190   :  { %v393_v16 = vpop.f32.mrf.mxu2 }
 0x191   :  { %v394_v39 = vadd.f32 %v393_v16, %v331_v13 }
 0x193   :  { %v458_v48 = vadd.f32 %v429_v47, %v394_v39 }
 0x195   :  { %v466_v58 = vmul.f32 0.01, %v458_v48 }
 0x197   :  { %v474_v61 = vmax.f32 %v458_v48, %v466_v58 }
 0x198   :  { %v395_v17 = vpop.f32.mrf.mxu2 }
 0x199   :  { %v396_v36 = vadd.f32 %v395_v17, %v333_v15 }
 0x19b   :  { %v459_v44 = vadd.f32 %v434_v35, %v396_v36 }
 0x19d   :  { %v467_v54 = vmul.f32 0.01, %v459_v44 }
 0x19f   :  { %v475_v59 = vmax.f32 %v459_v44, %v467_v54 }
 0x1a0   :  { %v398_v19 = vpop.f32.mrf.mxu2 }
 0x1a1   :  { %v399_v32 = vadd.f32 %v398_v19, %v336_v18 }
 0x1a3   :  { %v460_v40 = vadd.f32 %v439_v28, %v399_v32 }
 0x1a5   :  { %v468_v50 = vmul.f32 0.01, %v460_v40 }
 0x1a7   :  { %v476_v57 = vmax.f32 %v460_v40, %v468_v50 }
 0x1a8   :  { %v400_v21 = vpop.f32.mrf.mxu2 }
 0x1a9   :  { %v401_v29 = vadd.f32 %v400_v21, %v338_v20 }
 0x1ab   :  { %v461_v37 = vadd.f32 %v444_v27, %v401_v29 }
 0x1ad   :  { %v469_v46 = vmul.f32 0.01, %v461_v37 }
 0x1af   :  { %v477_v53 = vmax.f32 %v461_v37, %v469_v46 }
 0x1b0   :  { %v403_v25 = vpop.f32.mrf.mxu2 }
 0x1b1   :  { %v404_v26 = vadd.f32 %v403_v25, %v341_v23 }
 0x1b3   :  { %v462_v33 = vadd.f32 %v449_v24, %v404_v26 }
 0x1b5   :  { %v470_v42 = vmul.f32 0.01, %v462_v33 }
 0x1b7   :  { %v478_v49 = vmax.f32 %v462_v33, %v470_v42 }
 0x1b8   :  { %v405_v31 = vpop.f32.mrf.mxu2 }
 0x1b9   :  { %v406_v34 = vadd.f32 %v405_v31, %v343_v30 }
 0x1bb   :  { %v463_v38 = vadd.f32 %v454_v22, %v406_v34 }
 0x1bd   :  { %v471_v41 = vmul.f32 0.01, %v463_v38 }
 0x1bf   :  { %v479_v45 = vmax.f32 %v463_v38, %v471_v41 }
 0x1c1   :  { %492 = vmatpush.msrb.mxu3 %v479_v45 }
 0x1c3   :  { %493 = vmatpush.msrb.mxu3 %v478_v49 }
 0x1c5   :  { %494 = vmatpush.msrb.mxu3 %v477_v53 }
 0x1c7   :  { %495 = vmatpush.msrb.mxu3 %v476_v57 }
 0x1c9   :  { %496 = vmatpush.msrb.mxu3 %v475_v59 }
 0x1cb   :  { %497 = vmatpush.msrb.mxu3 %v474_v61 }
 0x1cd   :  { %498 = vmatpush.msrb.mxu3 %v473_v63 }
 0x1cf   :  { %499 = vmatpush.msrb.mxu3 %v472_v0 }
 0x1d0   :  { %572 = vmatmul.msk.f32.vlgmr.msrb.gmra.mxu3 %vm366_vm2, %v480_v1 }
 0x253   :  { %v501_v3 = vpop.f32.mrf.mxu3 }
 0x254   :  { %v506_v4 = vadd.f32 %v505_v2, %v501_v3 }
 0x256   :  { %507 = vst [vmem:[%s875_s9] sm:$0x1] %v506_v4 }

</bundles_post_ra>
